<compile_context>
chip_gen: v6e
topology: v6e:2x2x1
jax: 0.10.0
libtpu: 0.0.40
codegen_flags: <defaults>
</compile_context>

<pallas_src>
import functools

import jax
import jax.numpy as jnp
from jax.experimental import pallas as pl
from jax.experimental.pallas import tpu as pltpu


# --------------------------------------------------------------------------- #
# Kernels
# --------------------------------------------------------------------------- #
def norm_kernel(x_ref, o_ref):
    """Single-pass: block holds the full set axis N -> one in-block reduction."""
    xf = x_ref[...].astype(jnp.float32)
    n = x_ref.shape[-2]
    mean = jnp.sum(xf, axis=-2, keepdims=True) * (1.0 / n)
    o_ref[...] = (xf - mean).astype(o_ref.dtype)


def _mean_kernel(x_ref, m_ref, acc_ref, *, n_total, tn, mask_tail):
    """Two-pass, pass 1: accumulate per-column f32 sums over the N grid axis."""
    n_idx = pl.program_id(2)

    @pl.when(n_idx == 0)
    def _():
        acc_ref[...] = jnp.zeros_like(acc_ref)

    x = x_ref[...].astype(jnp.float32)
    if mask_tail:
        row = jax.lax.broadcasted_iota(jnp.int32, x.shape, x.ndim - 2)
        x = jnp.where(row + n_idx * tn < n_total, x, 0.0)
    acc_ref[...] += jnp.sum(x, axis=-2, keepdims=True)

    @pl.when(n_idx == pl.num_programs(2) - 1)
    def _():
        m_ref[...] = acc_ref[...] * (1.0 / n_total)


def _center_kernel(x_ref, m_ref, o_ref):
    """Two-pass, pass 2: subtract the precomputed f32 mean (elementwise)."""
    o_ref[...] = (x_ref[...].astype(jnp.float32) - m_ref[...]).astype(o_ref.dtype)


# --------------------------------------------------------------------------- #
# Planning (generation-aware budgets, tile selection, batch packing)
# --------------------------------------------------------------------------- #
def _vmem_budgets():
    """(max_block_bytes, vmem_limit_bytes) derived from the chip's VMEM size."""
    cap = None
    try:
        info = pltpu.get_tpu_info()
        cap = int(getattr(info, "vmem_capacity_bytes", 0)) or None
    except Exception:
        cap = None
    if cap is None:
        cap = 64 * 1024 * 1024  # conservative default: v7x per-TensorCore VMEM
    # Keep the pipelined footprint (~2 in + 2 out buffers = 4x block, plus an
    # f32 working copy for sub-32-bit inputs) well under the scoped limit.
    vmem_limit = min((cap * 3) // 4, 64 * 1024 * 1024)   # v7x: 48 MiB, else 64 MiB
    max_block = max(512 * 1024, vmem_limit // 8)          # v7x: 6 MiB, else 8 MiB
    return max_block, vmem_limit


def _single_pass_plan(B, N, D, itemsize, max_block_bytes):
    """Block (bt, N, td): full set axis resident per step.  None if N too big."""
    eff = max(itemsize, 4)  # budget the in-kernel f32 working copy too
    if D % 128 == 0:
        td = None
        for cand in (2048, 1024, 512, 384, 256, 128):
            if D % cand == 0 and N * cand * eff <= max_block_bytes:
                td = cand
                break
        if td is None:
            return None  # even (N, 128) over budget -> two-pass path
    else:
        # Small / odd feature dim: block must span all of D (masked lane stores).
        # TODO(synk): for large B with D < 128, a wrapper-side repack to a
        # lane-dense (N, B*D) slab would avoid masked vst.msk partial stores.
        if N * D * eff > max_block_bytes:
            return None
        td = D
    d_tiles = D // td

    # Pack batches so each grid step moves ~max_block_bytes, but keep >= 2 grid
    # steps when B >= 2 so both v7x TensorCores get work.
    slab_bytes = max(1, N * td * eff)
    bt_cap = max(1, max_block_bytes // slab_bytes)
    if d_tiles == 1 and B >= 2:
        bt_cap = min(bt_cap, max(1, B // 2))
    bt = 1
    for cand in range(min(B, bt_cap), 0, -1):
        if B % cand == 0:
            bt = cand
            break
    grid = (B // bt, d_tiles)
    spec = pl.BlockSpec((bt, N, td), lambda b, d: (b, 0, d))
    return grid, spec


def _two_pass_tiles(N, D, itemsize, max_block_bytes):
    eff = max(itemsize, 4)
    if D % 128 == 0:
        td = 128
        for cand in (1024, 512, 256, 128):
            if D % cand == 0 and 8 * cand * eff <= max_block_bytes:
                td = cand
                break
    else:
        td = D
    tn_cap = max(8, (max_block_bytes // (td * eff)) // 8 * 8)
    tn = min(tn_cap, max(8, (N // 8) * 8))
    return tn, td


# --------------------------------------------------------------------------- #
# Wrappers
# --------------------------------------------------------------------------- #
def _two_pass_norm(x3, itemsize, max_block_bytes, vmem_limit):
    B, N, D = x3.shape
    tn, td = _two_pass_tiles(N, D, itemsize, max_block_bytes)
    d_tiles = D // td
    n_tiles = pl.cdiv(N, tn)
    mask_tail = (N % tn) != 0

    mean = pl.pallas_call(
        functools.partial(_mean_kernel, n_total=N, tn=tn, mask_tail=mask_tail),
        out_shape=jax.ShapeDtypeStruct((B, 1, D), jnp.float32),
        grid_spec=pltpu.PrefetchScalarGridSpec(
            num_scalar_prefetch=0,
            grid=(B, d_tiles, n_tiles),
            in_specs=[pl.BlockSpec((1, tn, td), lambda b, d, n: (b, n, d))],
            out_specs=pl.BlockSpec((1, 1, td), lambda b, d, n: (b, 0, d)),
            scratch_shapes=[pltpu.VMEM((1, 1, td), jnp.float32)],
        ),
        compiler_params=pltpu.CompilerParams(
            dimension_semantics=("parallel", "parallel", "arbitrary"),
            vmem_limit_bytes=vmem_limit,
        ),
        cost_estimate=pl.CostEstimate(
            flops=B * N * D, transcendentals=0,
            bytes_accessed=B * N * D * itemsize + B * D * 4),
    )(x3)

    out = pl.pallas_call(
        _center_kernel,
        out_shape=jax.ShapeDtypeStruct((B, N, D), x3.dtype),
        grid_spec=pltpu.PrefetchScalarGridSpec(
            num_scalar_prefetch=0,
            grid=(B, d_tiles, n_tiles),
            in_specs=[pl.BlockSpec((1, tn, td), lambda b, d, n: (b, n, d)),
                      pl.BlockSpec((1, 1, td), lambda b, d, n: (b, 0, d))],
            out_specs=pl.BlockSpec((1, tn, td), lambda b, d, n: (b, n, d)),
        ),
        compiler_params=pltpu.CompilerParams(
            dimension_semantics=("parallel", "parallel", "parallel"),
            vmem_limit_bytes=vmem_limit,
        ),
        cost_estimate=pl.CostEstimate(
            flops=B * N * D, transcendentals=0,
            bytes_accessed=2 * B * N * D * itemsize + B * D * 4),
    )(x3, mean)
    return out


def set_norm(x, *, max_block_bytes=None):
    """x: (..., N, D). Returns x - mean(x, axis=-2, keepdims=True)."""
    orig_shape = x.shape
    x3 = x.reshape((-1,) + x.shape[-2:])
    B, N, D = x3.shape
    itemsize = jnp.dtype(x3.dtype).itemsize

    auto_block, vmem_limit = _vmem_budgets()
    if max_block_bytes is None:
        max_block_bytes = auto_block

    plan = _single_pass_plan(B, N, D, itemsize, max_block_bytes)
    if plan is not None:
        grid, spec = plan
        out = pl.pallas_call(
            norm_kernel,
            out_shape=jax.ShapeDtypeStruct((B, N, D), x3.dtype),
            grid_spec=pltpu.PrefetchScalarGridSpec(
                num_scalar_prefetch=0,
                grid=grid,
                in_specs=[spec],
                out_specs=spec,
            ),
            compiler_params=pltpu.CompilerParams(
                dimension_semantics=("parallel", "parallel"),
                vmem_limit_bytes=vmem_limit,
            ),
            cost_estimate=pl.CostEstimate(
                flops=2 * B * N * D,
                transcendentals=0,
                bytes_accessed=2 * B * N * D * itemsize,
            ),
        )(x3)
    else:
        # Large-N fallback: two passes (mean reduction, then subtraction).
        out = _two_pass_norm(x3, itemsize, max_block_bytes, vmem_limit)

    return out.reshape(orig_shape)


# --------------------------------------------------------------------------- #
# Tests
# --------------------------------------------------------------------------- #
def _reference(x):
    xf = x.astype(jnp.float32)
    return xf - jnp.mean(xf, axis=-2, keepdims=True)


def _check(out, x, atol, rtol):
    assert out.shape == x.shape and out.dtype == x.dtype
    assert jnp.allclose(out.astype(jnp.float32), _reference(x), atol=atol, rtol=rtol)


if __name__ == "__main__":
    key = jax.random.PRNGKey(0)
    k1, k2, k3, k4 = jax.random.split(key, 4)

    # 1) Set-data shape with a small odd feature dim (full-D block, packed batches).
    x = jax.random.normal(k1, (2, 16, 32), dtype=jnp.float32)
    out = set_norm(x)
    jax.block_until_ready(out)
    _check(out, x, atol=1e-5, rtol=1e-5)

    # 2) Lane-aligned feature dim -> single-pass, batch-packed, D-tiled path.
    x2 = jax.random.normal(k2, (2, 16, 256), dtype=jnp.float32)
    out2 = set_norm(x2)
    jax.block_until_ready(out2)
    _check(out2, x2, atol=1e-5, rtol=1e-5)

    # 3) Force the two-pass large-N fallback at a small shape (N % tn != 0, so
    #    the masked partial-tile reduction is exercised too).
    x3 = jax.random.normal(k3, (2, 40, 256), dtype=jnp.float32)
    out3 = set_norm(x3, max_block_bytes=16 * 1024)
    jax.block_until_ready(out3)
    _check(out3, x3, atol=1e-5, rtol=1e-5)

    # 4) bf16 input: f32 accumulation + f32 subtraction inside the kernel.
    x4 = jax.random.normal(k4, (2, 16, 256), dtype=jnp.bfloat16)
    out4 = set_norm(x4)
    jax.block_until_ready(out4)
    _check(out4, x4, atol=3e-2, rtol=3e-2)

    print("KERNEL_OK")
</pallas_src>

<mosaic_0001>
module attributes {stable_mosaic.version = 11 : i64} {
  func.func @norm_kernel(%arg0: i32, %arg1: i32, %arg2: memref<1x16x32xf32, #tpu.memory_space<vmem>>, %arg3: memref<1x16x32xf32, #tpu.memory_space<vmem>>) attributes {dimension_semantics = [#tpu.dimension_semantics<parallel>, #tpu.dimension_semantics<parallel>], iteration_bounds = array<i64: 2, 1>, scalar_prefetch = 0 : i64, scratch_operands = 0 : i64, tpu.core_type = #tpu.core_type<tc>, window_params = [{transform_indices = @transform_0, window_bounds = array<i64: 1, 16, 32>}, {transform_indices = @transform_1, window_bounds = array<i64: 1, 16, 32>}]} {
    %c0 = arith.constant 0 : index
    %c0_0 = arith.constant 0 : index
    %c0_1 = arith.constant 0 : index
    %0 = vector.load %arg2[%c0, %c0_0, %c0_1] : memref<1x16x32xf32, #tpu.memory_space<vmem>>, vector<1x16x32xf32>
    %cst = arith.constant dense<0.000000e+00> : vector<1x32xf32>
    %1 = vector.multi_reduction <add>, %0, %cst [1] : vector<1x16x32xf32> to vector<1x32xf32>
    %2 = vector.shape_cast %1 : vector<1x32xf32> to vector<1x1x32xf32>
    %cst_2 = arith.constant 6.250000e-02 : f32
    %3 = vector.broadcast %cst_2 : f32 to vector<1x1x32xf32>
    %4 = arith.mulf %2, %3 : vector<1x1x32xf32>
    %5 = vector.broadcast %4 : vector<1x1x32xf32> to vector<1x16x32xf32>
    %6 = arith.subf %0, %5 : vector<1x16x32xf32>
    %c0_3 = arith.constant 0 : index
    %c0_4 = arith.constant 0 : index
    %c0_5 = arith.constant 0 : index
    %7 = vector.load %arg3[%c0_3, %c0_4, %c0_5] : memref<1x16x32xf32, #tpu.memory_space<vmem>>, vector<1x16x32xf32>
    tpu.vector_store %arg3[%c0_3, %c0_4, %c0_5], %6 {strides = array<i32>} : memref<1x16x32xf32, #tpu.memory_space<vmem>>, vector<1x16x32xf32>,
    return
  }
  func.func @transform_0(%arg0: i32, %arg1: i32) -> (i32, i32, i32) {
    %c0_i32 = arith.constant 0 : i32
    %c0_i32_0 = arith.constant 0 : i32
    return %arg0, %c0_i32, %arg1 : i32, i32, i32
  }
  func.func @transform_1(%arg0: i32, %arg1: i32) -> (i32, i32, i32) {
    %c0_i32 = arith.constant 0 : i32
    %c0_i32_0 = arith.constant 0 : i32
    return %arg0, %c0_i32, %arg1 : i32, i32, i32
  }
}

</mosaic_0001>

<bundles_post_ra>
// kernel: tpu_custom_call.1
= control target key start
LH: loop header
LB: loop body
LE: loop exit
PB: predicated region body
PF: predicated region fallthrough
CT: control target
= control target key end

     0   :  { %6 = vsyncpa [#allocation3], 0  ;;  %s628_s0 = inlined_call_operand.hbm [shape: f32[2,16,32], index: 0, kind: input, shape index: {}]   ;;  %s629_s1 = inlined_call_operand.hbm [shape: f32[2,16,32], index: 1, kind: output, shape index: {}]  }
   0x1   :  { %8 = vsyncpa [#allocation3 + $0x1], 0 }
   0x2   :  { %9 = vsyncpa [#allocation4], 0 }
   0x3   :  { %11 = vsyncpa [#allocation4 + $0x1], 0  ;;  %s478_s6 = smov 0   ;;  %s480_s7 = smov 0  }
   0x4   :  { %s482_s8 = smov 0   ;;  %s484_s9 = smov 0  }
   0x5   :  { %s486_s10 = smov 0   ;;  %s488_s11 = smov 0  }
   0x6 LB: > { %s269_s12 = sadd.s32 4294967295, %s460_s11   ;;  %s270_s13 = sadd.s32 4294967294, %s460_s11   ;;  %s460_s11 = sphi %s488_s11, %s17_s11   ;;  %s456_s10 = sphi %s486_s10, %s640_s10   ;;  %s452_s9 = sphi %s484_s9, %s639_s9   ;;  %s448_s8 = sphi %s482_s8, %s638_s8   ;;  %s444_s7 = sphi %s480_s7, %s637_s7   ;;  %s440_s6 = sphi %s478_s6, %s636_s6  }
   0x7   : > { %s29_s14 = sadd.s32 1, %s456_s10  ;;  %s38_s15 = sadd.s32 1, %s448_s8 }
   0x8   : > { %p31_p0 = scmp.ge.s32.totalorder %s29_s14, 2  ;;  %p45_p1 = scmp.ne.s32.totalorder %s448_s8, %s444_s7 }
   0x9   : > { %p46_p2 = scmp.eq.s32.totalorder %s460_s11, 0  ;;  %p51_p3 = scmp.ne.s32.totalorder %s444_s7, %s440_s6 }
   0xa   : > { %s642_s14 = smov (%p31_p0, %s29_s14), 0  ;;  %p52_p5 = scmp.eq.s32.totalorder %s269_s12, 0 }
   0xb   : > { %p519_p4 = por %p46_p2, %p45_p1  ;;  %s33_s17 = ssub.s32 %s456_s10, %s642_s14 }
   0xc   : > { %p77_p6 = scmp.eq.s32.totalorder %s269_s12, 1  ;;  %p36_p7 = scmp.eq.s32.totalorder %s33_s17, 0 }
   0xd   : > { %p525_p8 = por %p52_p5, %p51_p3  ;;  %p83_p10 = scmp.eq.s32.totalorder %s270_s13, 1 }
   0xe   : > { %p529_p9 = por %p77_p6, %p45_p1  ;;  %p298_p13 = scmp.lt.s32.totalorder %s460_s11, 2 }
   0xf   : > { %s534_s20 = scalar_select %p36_p7, %s448_s8, %s38_s15  }
  0x10   : > { %p536_p11 = por %p83_p10, %p51_p3  ;;  %s103_s22 = sand.u32 1, %s448_s8  }
  0x11   : > { %s273_s23 = sshll.u32 %s103_s22, 4  ;;  %s284_s24 = sshll.u32 %s456_s10, 8 }
  0x12   : > { %s114_s27 = scalar_lea.hbm %s628_s0, %s284_s24  ;;  %s107_s28 = scalar_lea.vmem [#allocation2], %s273_s23 }
  0x13   : > { %s115_s29 = sshll.u32 %s107_s28, 4  ;;  %p549_p0 = pnand %p298_p13, %p519_p4  ;;  %s116_s29 = int_to_ptr.vmem [resolvable:$true] %s115_s29 }
  0x14   : > { %p276_p1 = scmp.ge.s32.totalorder %s460_s11, 1  ;;  %s104_s2 = scalar_lea.sflag [#allocation3], %s103_s22 }
  0x15   : > { %p354_p2 = pneg %p549_p0  ;;  %s365_s3 = scalar_lea.vmem %s116_s29, 256 }
  0x16   : > { %p366_p3 = scmp.ne.s32.totalorder %s116_s29, %s365_s3  ;;  %s462_s4 = smov [#allocation2]  }
  0x17   : > { %s370_s5 = sshll.u32 %s462_s4, 4  ;;  %s371_s5 = int_to_ptr.vmem [resolvable:$false] %s370_s5 }
  0x18   : > { %p368_p5 = pnand %p366_p3, %p354_p2  ;;  %s372_s12 = scalar_lea.vmem %s371_s5, 512 }
  0x19   : > { %p373_p7 = scmp.lt.s32.totalorder %s116_s29, %s371_s5  ;;  %p374_p10 = scmp.lt.s32.totalorder %s372_s12, %s365_s3 }
  0x1a   : > { %p369_p6 = pneg %p368_p5 }
  0x1b   : > { %p375_p12 = por %p374_p10, %p373_p7 }
  0x1d   : > { %p376_p4 = pnand %p375_p12, %p369_p6 }
  0x1f   : > { %379 = shalt.err (!%p376_p4)
}
  0x20   : > { %s463_s13 = smov 128   ;;  %s464_s15 = smov 8  }
  0x21   : > { %293 = dma.hbm_to_vmem [thread:$0]  (!%p549_p0), %s114_s27, 256, %s116_s29, %s104_s2, %s463_s13, %s463_s13, %s464_s15  }
  0x22   : > { %p123_p13 = scmp.lt.s32.totalorder %s460_s11, 3 }
  0x24   : > { %p124_p2 = pnand %p276_p1, %p123_p13 }
  0x25   : > { %s562_s16 = sand.u32 (!%p124_p2), 1, %s444_s7  }
  0x26   : > { %127 = sbr.rel (%p124_p2) target bundleno = 78 (0x4e), region = 24  ;;  %s277_s17 = sshll.u32 (!%p124_p2), %s562_s16, 4 }
  0x27   : > { %s130_s22 = scalar_lea.sflag (!%p124_p2), [#allocation3], %s562_s16  ;;  %s133_s23 = scalar_lea.vmem (!%p124_p2), [#allocation2], %s277_s17 }
  0x2b   : > { %431 = dma.done.wait (%p525_p8), %s130_s22, 256  }
  0x2c   : > { %433 = vsyncadd (%p525_p8), %s130_s22, 4294967040  ;;  %vm154_vm0 = vcmask 261120   ;;  %v152_v0 = vld [vmem:[%s133_s23] sm:$0xff]  ;;  %v153_v1 = vld [vmem:[%s133_s23 + $0x8] sm:$0xff]  ;;  %s151_s24 = scalar_lea.vmem [#allocation5], %s277_s17  ;;  %s285_s25 = sshll.u32 %s452_s9, 8 }
  0x2d   : > { %v155_v2 = vsel %vm154_vm0, %v152_v0, 0.0  ;;  %v156_v3 = vsel %vm154_vm0, %v153_v1, 0.0  ;;  %s184_s18 = sshll.u32 %s151_s24, 4  ;;  %s578_s28 = scalar_lea.hbm %s629_s1, %s285_s25  ;;  %s573_s18 = int_to_ptr.vmem [resolvable:$true] %s184_s18 }
  0x2e   : > { %v157_v4 = vadd.f32 %v156_v3, %v155_v2  ;;  %s170_s29 = scalar_lea.sflag [#allocation4], %s562_s16  ;;  %s380_s30 = scalar_lea.vmem %s573_s18, 256 }
  0x2f   : > { %p381_p8 = scmp.ne.s32.totalorder %s573_s18, %s380_s30  ;;  %s465_s9 = smov [#allocation5]  }
  0x30   : > { %v158_v5 = vrot.slane %v157_v4, 4  ;;  %s384_s2 = sshll.u32 %s465_s9, 4  ;;  %s385_s2 = int_to_ptr.vmem [resolvable:$false] %s384_s2 }
  0x31   : > { %p382_p12 = pnand %p381_p8, %p529_p9  ;;  %s386_s3 = scalar_lea.vmem %s385_s2, 512 }
  0x32   : > { %v159_v6 = vadd.f32 %v158_v5, %v157_v4  ;;  %p387_p1 = scmp.lt.s32.totalorder %s573_s18, %s385_s2  ;;  %p388_p3 = scmp.lt.s32.totalorder %s386_s3, %s380_s30 }
  0x33   : > { %p383_p0 = pneg %p382_p12 }
  0x34   : > { %v160_v7 = vrot.slane %v159_v6, 2  ;;  %p389_p5 = por %p388_p3, %p387_p1 }
  0x36   : > { %v161_v8 = vadd.f32 %v160_v7, %v159_v6  ;;  %p390_p6 = pnand %p389_p5, %p383_p0 }
  0x38   : > { %v162_v9 = vrot.slane %v161_v8, 1 }
  0x3a   : > { %v163_v10 = vadd.f32 %v162_v9, %v161_v8 }
  0x3c   : > { %v164_v11 = vmul.f32 0.0625, %v163_v10 }
  0x3e   : > { %v165_v12 = vsub.f32 %v152_v0, %v164_v11  ;;  %v166_v13 = vsub.f32 %v153_v1, %v164_v11 }
  0x40   : > { %167 = vst.msk [vmem:[%s151_s24] sm:$0xff] %vm154_vm0, %v165_v12  ;;  %168 = vst.msk [vmem:[%s151_s24 + $0x8] sm:$0xff] %vm154_vm0, %v166_v13 }
  0x41   : > { %393 = shalt.err (!%p390_p6)
}
  0x42   : > { %s394_s4 = scalar_lea.hbm %s578_s28, 256  ;;  %s398_s13 = scalar_lea.hbm %s629_s1, 512 }
  0x43   : > { %p395_p7 = scmp.ne.s32.totalorder %s578_s28, %s394_s4  ;;  %p399_p13 = scmp.lt.s32.totalorder %s578_s28, %s629_s1 }
  0x44   : > { %p400_p2 = scmp.lt.s32.totalorder %s398_s13, %s394_s4 }
  0x45   : > { %p396_p10 = pnand %p395_p7, %p529_p9 }
  0x46   : > { %p401_p8 = por %p400_p2, %p399_p13 }
  0x47   : > { %p397_p4 = pneg %p396_p10 }
  0x49   : > { %p402_p12 = pnand %p401_p8, %p397_p4 }
  0x4b   : > { %405 = shalt.err (!%p402_p12)
}
  0x4c   : > { %s466_s22 = smov 128   ;;  %s467_s23 = smov 8  }
  0x4d   : > { %288 = dma.vmem_to_hbm [thread:$0]  (%p529_p9), %s573_s18, 256, %s578_s28, %s170_s29, %s466_s22, %s466_s22, %s467_s23  }
  0x4e PF: > { %s199_s24 = sand.u32 1, %s440_s6   ;;  %p635_p0 = scmp.ge.s32.totalorder %s460_s11, 2 }
  0x4f   : > { %s200_s25 = scalar_lea.sflag [#allocation4], %s199_s24 }
  0x50   : > { %p295_p1 = pnand %p635_p0, %p536_p11 }
  0x52   : > { %p296_p3 = pneg %p295_p1 }
  0x54   : > { %435 = dma.done.wait (%p296_p3), %s200_s25, 256  }
  0x55   : > { %437 = vsyncadd (%p296_p3), %s200_s25, 4294967040  ;;  %s17_s11 = sadd.s32 1, %s460_s11   ;;  %s636_s6 = smov %s444_s7 }
  0x56   : > { %p14_p5 = scmp.ge.s32.totalorder %s17_s11, 4   ;;  %s637_s7 = smov %s448_s8 }
  0x57   : > { %s638_s8 = smov %s534_s20  ;;  %s639_s9 = smov %s456_s10 }
  0x58   : > { %s640_s10 = smov %s642_s14  ;;  %16 = sbr.rel (!%p14_p5) target bundleno = 6 (0x6), region = 69 }
  0x5d   :  { %205 = vsyncpa [#allocation3], 1 }
  0x5e   :  { %207 = vsyncpa [#allocation3 + $0x1], 1 }
  0x5f   :  { %208 = vsyncpa [#allocation4], 1 }
  0x60   :  { %210 = vsyncpa [#allocation4 + $0x1], 1 }

</bundles_post_ra>
